<compile_context>
chip_gen: v7x
topology: tpu7x:2x2x1
jax: 0.10.0
libtpu: 0.0.40
codegen_flags: <defaults>
</compile_context>

<pallas_src>
import math

import jax
import jax.numpy as jnp
from jax.experimental import pallas as pl
from jax.experimental.pallas import tpu as pltpu

_LANE = 128     # TPU lane width
_SUBLANE = 8    # f32 sublane height


def _softmax_stable_kernel(x_ref, o_ref):
    # Whole hot path in VMEM: max-reduce, exp, sum-reduce, scale.
    x = x_ref[...].astype(jnp.float32)            # f32 compute (safe on v5e)
    c = jnp.max(x, axis=-1, keepdims=True)        # row-wise max (stability, XLU)
    e = jnp.exp(x - c)                            # EUP
    s = jnp.sum(e, axis=-1, keepdims=True)        # XLU
    # Exact divide: the kernel is HBM-bandwidth-bound, so this (tile,1)-column
    # divide is free and keeps ~1e-6 accuracy (perf-review item).
    o_ref[...] = (e / s).astype(o_ref.dtype)


def _round_up(v, m):
    return ((v + m - 1) // m) * m


def _vmem_capacity_bytes():
    try:
        return int(pltpu.get_tpu_info().vmem_capacity_bytes)
    except Exception:
        return 64 * 1024 * 1024   # conservative: v7x physical VMEM per TC


def _num_tensorcores():
    # v7x has 2 TensorCores per chip; v5e/v6e have 1.
    try:
        kind = jax.devices()[0].device_kind.lower()
        if "v7" in kind or "7x" in kind:
            return 2
    except Exception:
        pass
    return 1


def _choose_row_tile(rows, feats, itemsize, vmem_cap, num_cores):
    """Row tile sized by bytes (not a fixed row cap), bounded by the VMEM budget."""
    rows8 = _round_up(max(rows, 1), _SUBLANE)
    feats_lane = _round_up(feats, _LANE)          # VMEM lane padding of a row

    # Per-row VMEM footprint: double-buffered input + output blocks plus ~3 f32
    # temporaries inside the body.  Keep the total under ~60% of VMEM so Mosaic
    # has headroom for internal scratch (matters on v7x's 64 MiB VMEM).
    per_row_vmem = feats_lane * (2 * itemsize + 2 * itemsize + 3 * 4)
    vmem_budget = int(0.6 * vmem_cap)
    tile_vmem = (vmem_budget // max(per_row_vmem, 1)) // _SUBLANE * _SUBLANE

    # Target ~8 MiB of *input* per block so the ~0.35 us per-grid-step overhead
    # is amortized even at v7x HBM bandwidth (bytes-based cap, not 1024 rows).
    per_row_in = feats_lane * itemsize
    tile_bytes = ((8 << 20) // max(per_row_in, 1)) // _SUBLANE * _SUBLANE

    tile = max(_SUBLANE, min(tile_vmem, tile_bytes, rows8))

    # Only split the row axis for parallelism on chips that actually have more
    # than one TensorCore (v7x); on v5e/v6e the grid is a serial loop and
    # shrinking the tile just adds per-step overhead.
    if num_cores > 1:
        min_steps = 2 * num_cores     # >=2 steps per core keeps per-core pipelining
        if rows8 >= min_steps * _SUBLANE and pl.cdiv(rows, tile) < min_steps:
            tile = max(_SUBLANE, _round_up(pl.cdiv(rows8, min_steps), _SUBLANE))
    return max(_SUBLANE, (tile // _SUBLANE) * _SUBLANE)


def softmax_stable(x, dim=1, *, row_tile=None):
    """Numerically-stable softmax over `dim` (matches SoftMaxStable.forward)."""
    if not jnp.issubdtype(x.dtype, jnp.floating):
        x = x.astype(jnp.float32)     # integer inputs: promote (torch would error)
    orig_dtype = x.dtype
    dim = dim % x.ndim

    # Move the softmax axis to the lane (last) axis only when it is not already
    # there; for dim == -1 this is a no-op.
    # TODO(synk): for large tensors with dim == ndim-2, reduce over axis=-2 in
    # the kernel (sublane reduce) instead of paying this transpose HBM pass.
    moved = dim != x.ndim - 1
    xm = jnp.moveaxis(x, dim, -1) if moved else x
    moved_shape = xm.shape
    feats = moved_shape[-1]
    rows = math.prod(moved_shape[:-1]) if len(moved_shape) > 1 else 1
    x2 = xm.reshape(rows, feats)

    itemsize = jnp.dtype(orig_dtype).itemsize
    vmem_cap = _vmem_capacity_bytes()
    num_cores = _num_tensorcores()

    tile = row_tile if row_tile is not None else _choose_row_tile(
        rows, feats, itemsize, vmem_cap, num_cores)
    if tile >= rows:
        # Single block covering the whole row axis; block dims equal the array
        # dims, so no (8,128)-divisibility or padding is needed.
        tile = rows
    grid_rows = pl.cdiv(rows, tile)

    # No wrapper-side jnp.pad / output slice (perf-review item): the block last
    # dim is the full `feats`, and any ragged row tail is a partial last block
    # (OOB rows read garbage, their writes are dropped; rows are independent).
    # TODO(synk): for vocab-scale feats where a single (8, feats) f32 block
    # exceeds VMEM, switch to a two-pass / online softmax over a feature grid
    # axis instead of shrinking the row tile toward 1.

    feats_lane = _round_up(feats, _LANE)
    block_bytes = tile * feats_lane * itemsize
    need = 2 * block_bytes + 2 * block_bytes + 3 * tile * feats_lane * 4 + (2 << 20)
    vmem_limit = int(min(int(0.8 * vmem_cap), max(need, 32 << 20)))

    out = pl.pallas_call(
        _softmax_stable_kernel,
        out_shape=jax.ShapeDtypeStruct((rows, feats), orig_dtype),
        grid_spec=pltpu.PrefetchScalarGridSpec(
            num_scalar_prefetch=0,
            grid=(grid_rows,),
            in_specs=[pl.BlockSpec((tile, feats), lambda i: (i, 0))],
            out_specs=pl.BlockSpec((tile, feats), lambda i: (i, 0)),
        ),
        compiler_params=pltpu.CompilerParams(
            # TODO(synk): on v7x, evaluate pltpu.CORE_PARALLEL / pl.core_map on
            # the row axis; "parallel" is the safe default on all generations.
            dimension_semantics=("parallel",),
            vmem_limit_bytes=vmem_limit,
        ),
    )(x2)

    out = out.reshape(moved_shape)
    return jnp.moveaxis(out, -1, dim) if moved else out


if __name__ == "__main__":
    key = jax.random.PRNGKey(0)
    k1, k2, k3, k4 = jax.random.split(key, 4)

    def ref_softmax(x, dim):
        c = jnp.max(x, axis=dim, keepdims=True)
        e = jnp.exp(x - c)
        return e / jnp.sum(e, axis=dim, keepdims=True)

    # (batch=16, hidden=128), softmax over dim=1: single full-array block, grid=1.
    x_small = jax.random.normal(k1, (16, 128), dtype=jnp.float32)
    out_small = jax.block_until_ready(softmax_stable(x_small, dim=1))
    assert jnp.allclose(out_small, ref_softmax(x_small, 1), atol=1e-5, rtol=1e-5)
    assert jnp.allclose(jnp.sum(out_small, axis=1), 1.0, atol=1e-5)

    # Ragged rows/feats (not multiples of 8/128): full-extent single block,
    # no wrapper padding or slicing.
    x_rag = jax.random.normal(k2, (10, 100), dtype=jnp.float32) * 3.0
    out_rag = jax.block_until_ready(softmax_stable(x_rag, dim=1))
    assert jnp.allclose(out_rag, ref_softmax(x_rag, 1), atol=1e-5, rtol=1e-5)
    assert jnp.allclose(jnp.sum(out_rag, axis=1), 1.0, atol=1e-5)

    # Multi-block path with a partial last row block (cdiv grid, no row pad).
    x_multi = jax.random.normal(k3, (40, 128), dtype=jnp.float32)
    out_multi = jax.block_until_ready(softmax_stable(x_multi, dim=1, row_tile=16))
    assert jnp.allclose(out_multi, ref_softmax(x_multi, 1), atol=1e-5, rtol=1e-5)
    assert jnp.allclose(jnp.sum(out_multi, axis=1), 1.0, atol=1e-5)

    # Softmax over a non-last axis (exercises the moveaxis path).
    x_d0 = jax.random.normal(k4, (12, 24), dtype=jnp.float32)
    out_d0 = jax.block_until_ready(softmax_stable(x_d0, dim=0))
    assert jnp.allclose(out_d0, ref_softmax(x_d0, 0), atol=1e-5, rtol=1e-5)

    # Docstring example: softmax(tensor([1,2,3]), dim=0).
    out_doc = jax.block_until_ready(softmax_stable(jnp.array([1.0, 2.0, 3.0]), dim=0))
    assert jnp.allclose(out_doc, jnp.array([0.0900, 0.2447, 0.6652]), atol=1e-3)

    print("KERNEL_OK")
</pallas_src>

<mosaic_0001>
module attributes {stable_mosaic.version = 11 : i64} {
  func.func @_softmax_stable_kernel(%arg0: i32, %arg1: memref<16x128xf32, #tpu.memory_space<vmem>>, %arg2: memref<16x128xf32, #tpu.memory_space<vmem>>) attributes {dimension_semantics = [#tpu.dimension_semantics<parallel>], iteration_bounds = array<i64: 1>, scalar_prefetch = 0 : i64, scratch_operands = 0 : i64, tpu.core_type = #tpu.core_type<tc>, window_params = [{transform_indices = @transform_0, window_bounds = array<i64: 16, 128>}, {transform_indices = @transform_1, window_bounds = array<i64: 16, 128>}]} {
    %c0 = arith.constant 0 : index
    %c0_0 = arith.constant 0 : index
    %0 = vector.load %arg1[%c0, %c0_0] : memref<16x128xf32, #tpu.memory_space<vmem>>, vector<16x128xf32>
    %cst = arith.constant dense<0xFF800000> : vector<16xf32>
    %1 = vector.multi_reduction <maximumf>, %0, %cst [1] : vector<16x128xf32> to vector<16xf32>
    %2 = vector.shape_cast %1 : vector<16xf32> to vector<16x1xf32>
    %3 = vector.broadcast %2 : vector<16x1xf32> to vector<16x128xf32>
    %4 = arith.subf %0, %3 : vector<16x128xf32>
    %5 = math.exp %4 : vector<16x128xf32>
    %cst_1 = arith.constant dense<0.000000e+00> : vector<16xf32>
    %6 = vector.multi_reduction <add>, %5, %cst_1 [1] : vector<16x128xf32> to vector<16xf32>
    %7 = vector.shape_cast %6 : vector<16xf32> to vector<16x1xf32>
    %8 = vector.broadcast %7 : vector<16x1xf32> to vector<16x128xf32>
    %9 = arith.divf %5, %8 : vector<16x128xf32>
    %c0_2 = arith.constant 0 : index
    %c0_3 = arith.constant 0 : index
    %10 = vector.load %arg2[%c0_2, %c0_3] : memref<16x128xf32, #tpu.memory_space<vmem>>, vector<16x128xf32>
    tpu.vector_store %arg2[%c0_2, %c0_3], %9 {strides = array<i32>} : memref<16x128xf32, #tpu.memory_space<vmem>>, vector<16x128xf32>,
    return
  }
  func.func @transform_0(%arg0: i32) -> (i32, i32) {
    %c0_i32 = arith.constant 0 : i32
    %c0_i32_0 = arith.constant 0 : i32
    return %arg0, %c0_i32 : i32, i32
  }
  func.func @transform_1(%arg0: i32) -> (i32, i32) {
    %c0_i32 = arith.constant 0 : i32
    %c0_i32_0 = arith.constant 0 : i32
    return %arg0, %c0_i32 : i32, i32
  }
}

</mosaic_0001>

<bundles_post_ra>
// kernel: tpu_custom_call.1
= control target key start
LH: loop header
LB: loop body
LE: loop exit
PB: predicated region body
PF: predicated region fallthrough
CT: control target
= control target key end

     0   :  { %6 = vsyncpa [#allocation3], 0  ;;  %s166_s0 = inlined_call_operand.hbm [shape: f32[16,128], index: 0, kind: input, shape index: {}]   ;;  %s167_s1 = inlined_call_operand.hbm [shape: f32[16,128], index: 1, kind: output, shape index: {}]  }
   0x1   :  { %7 = vsyncpa [#allocation4], 0  ;;  %s122_s6 = smov [#allocation2]   ;;  %s74_s10 = scalar_lea.hbm %s166_s0, 256 }
   0x2   :  { %s13_s7 = sshll.u32 %s122_s6, 4  ;;  %p75_p0 = scmp.ne.s32.totalorder %s166_s0, %s74_s10  ;;  %s14_s7 = int_to_ptr.vmem [resolvable:$true] %s13_s7 }
   0x3   :  { %p78_p1 = scmp.lt.u32.totalorder %s74_s10, %s166_s0 }
   0x5   :  { %p80_p2 = pnand %p78_p1, %p75_p0 }
   0x7   :  { %83 = shalt.err (!%p80_p2)
}
   0x8   :  { %s84_s15 = scalar_lea.vmem %s14_s7, 256  ;;  %p89_p4 = scmp.lt.s32.totalorder %s14_s7, %s14_s7 }
   0x9   :  { %p85_p3 = scmp.ne.s32.totalorder %s14_s7, %s84_s15  ;;  %p90_p5 = scmp.lt.s32.totalorder %s84_s15, %s84_s15 }
   0xb   :  { %p91_p6 = por %p90_p5, %p89_p4 }
   0xd   :  { %p92_p7 = pnand %p91_p6, %p85_p3 }
   0xf   :  { %95 = shalt.err (!%p92_p7)
}
  0x10   :  { %s123_s16 = smov 128   ;;  %s124_s17 = smov 8  }
  0x11   :  { %19 = dma.hbm_to_vmem [thread:$0]  %s166_s0, 256, %s14_s7, [#allocation3], %s123_s16, %s123_s16, %s124_s17  }
  0x12   :  { %118 = dma.done.wait [#allocation3], 256  }
  0x13   :  { %119 = vsyncadd [#allocation3], 4294967040  ;;  %v23_v0 = vld [vmem:[#allocation2] sm:$0xff]  ;;  %v24_v1 = vld [vmem:[#allocation2 + $0x8] sm:$0xff]  ;;  %s125_s0 = smov [#allocation5]  }
  0x14   :  { %25 = vmax.xlane.f32.xlu0 %v23_v0  ;;  %s50_s20 = sshll.u32 %s125_s0, 4  ;;  %s51_s20 = int_to_ptr.vmem [resolvable:$true] %s50_s20 }
  0x15   :  { %s96_s21 = scalar_lea.vmem %s51_s20, 256  ;;  %p101_p9 = scmp.lt.s32.totalorder %s51_s20, %s51_s20 }
  0x16   :  { %p97_p8 = scmp.ne.s32.totalorder %s51_s20, %s96_s21  ;;  %p102_p10 = scmp.lt.s32.totalorder %s96_s21, %s96_s21 }
  0x18   :  { %27 = vmax.xlane.f32.xlu0 %v24_v1  ;;  %p103_p11 = por %p102_p10, %p101_p9 }
  0x1a   :  { %p104_p12 = pnand %p103_p11, %p97_p8 }
  0xa1   :  { %v26_v2 = vpop.xlane.xlu0 %25 }
  0xa2   :  { %v29_v3 = vsub.f32 %v23_v0, %v26_v2 }
  0xa4   :  { %v31_v4 = vmul.f32 1.442695, %v29_v3 }
  0xa5   :  { %v28_v5 = vpop.xlane.xlu0 %27 }
  0xa6   :  { %66 = vpow2.f32 %v31_v4  ;;  %v30_v6 = vsub.f32 %v24_v1, %v28_v5 }
  0xa8   :  { %v33_v7 = vmul.f32 1.442695, %v30_v6 }
  0xaa   :  { %68 = vpow2.f32 %v33_v7 }
  0xb0   :  { %v67_v8 = vpop.eup %66 }
  0xb1   :  { %35 = vadd.xlane.f32.xlu1 %v67_v8 }
  0xb4   :  { %v69_v9 = vpop.eup %68 }
  0xb5   :  { %37 = vadd.xlane.f32.xlu1 %v69_v9 }
 0x13e   :  { %v36_v10 = vpop.xlane.xlu1 %35 }
 0x13f   :  { %70 = vrcp.f32 %v36_v10 }
 0x142   :  { %v38_v11 = vpop.xlane.xlu1 %37 }
 0x143   :  { %72 = vrcp.f32 %v38_v11 }
 0x149   :  { %v71_v12 = vpop.eup %70 }
 0x14a   :  { %v40_v13 = vmul.f32 %v71_v12, %v67_v8 }
 0x14c   :  { %43 = vst [vmem:[#allocation5] sm:$0xff] %v40_v13 }
 0x14d   :  { %v73_v14 = vpop.eup %72 }
 0x14e   :  { %v42_v15 = vmul.f32 %v73_v14, %v69_v9 }
 0x150   :  { %44 = vst [vmem:[#allocation5 + $0x8] sm:$0xff] %v42_v15 }
 0x151   :  { %107 = shalt.err (!%p104_p12)
}
 0x152   :  { %s108_s24 = scalar_lea.hbm %s167_s1, 256 }
 0x153   :  { %p109_p13 = scmp.ne.s32.totalorder %s167_s1, %s108_s24  ;;  %p112_p0 = scmp.lt.u32.totalorder %s108_s24, %s167_s1 }
 0x155   :  { %p114_p1 = pnand %p112_p0, %p109_p13 }
 0x157   :  { %117 = shalt.err (!%p114_p1)
}
 0x158   :  { %56 = dma.vmem_to_hbm [thread:$0]  %s51_s20, 256, %s167_s1, [#allocation4], %s123_s16, %s123_s16, %s124_s17  }
 0x159   :  { %120 = dma.done.wait [#allocation4], 256  }
 0x15a   :  { %121 = vsyncadd [#allocation4], 4294967040 }
 0x15b   :  { %60 = vsyncpa [#allocation3], 1 }
 0x15c   :  { %61 = vsyncpa [#allocation4], 1 }

</bundles_post_ra>
